<compile_context>
chip_gen: v7x
topology: tpu7x:2x2x1
jax: 0.10.0
libtpu: 0.0.40
codegen_flags: <defaults>
</compile_context>

<pallas_src>
import functools

import jax
import jax.numpy as jnp
from jax.experimental import pallas as pl
from jax.experimental.pallas import tpu as pltpu


def _round_up(x: int, m: int) -> int:
    return ((x + m - 1) // m) * m


def _pad_axis(a, axis, target):
    pad = target - a.shape[axis]
    if pad <= 0:
        return a
    widths = [(0, 0)] * a.ndim
    widths[axis] = (0, pad)
    return jnp.pad(a, widths)


# ----------------------------------------------------------------------------
# Kernel: tiled fused matmul + bias epilogue.
# ----------------------------------------------------------------------------
def _fused_linear_kernel(x_ref, w_ref, b_ref, o_ref, acc_ref):
    k = pl.program_id(2)

    @pl.when(k == 0)
    def _():
        acc_ref[...] = jnp.zeros_like(acc_ref)

    acc_ref[...] += jnp.dot(
        x_ref[...], w_ref[...], preferred_element_type=jnp.float32
    )

    @pl.when(k == pl.num_programs(2) - 1)
    def _():
        # Bias added once, after the K reduction, then cast to output dtype.
        o_ref[...] = (acc_ref[...] + b_ref[...]).astype(o_ref.dtype)


# Preferred tile sizes (f32). Double-buffered inputs + accumulator ~4.5 MiB.
_TM, _TN, _TK = 256, 512, 512


def _fused_matmul(x, w, b):
    """x: (B, D), w: (D, H), b: (1, H). Returns (B, H)."""
    B, D = x.shape
    H = w.shape[1]

    # Full-extent blocks are exempt from the (8, 128) alignment rule; otherwise
    # tiles are 8/128-aligned and the arrays are zero-padded up to a tile multiple
    # (zero K-padding contributes nothing to the accumulation, so the result is
    # exact; extra M/N rows/cols are sliced off below).
    tm = B if B <= _TM else _TM
    tk = D if D <= _TK else _TK
    tn = H if H <= _TN else _TN

    Bp = B if tm == B else _round_up(B, tm)
    Dp = D if tk == D else _round_up(D, tk)
    Hp = H if tn == H else _round_up(H, tn)

    xp = _pad_axis(_pad_axis(x, 0, Bp), 1, Dp)
    wp = _pad_axis(_pad_axis(w, 0, Dp), 1, Hp)
    bp = _pad_axis(b, 1, Hp)

    grid = (Bp // tm, Hp // tn, Dp // tk)

    out = pl.pallas_call(
        _fused_linear_kernel,
        out_shape=jax.ShapeDtypeStruct((Bp, Hp), x.dtype),
        grid_spec=pltpu.PrefetchScalarGridSpec(
            num_scalar_prefetch=0,
            grid=grid,
            in_specs=[
                pl.BlockSpec((tm, tk), lambda i, j, k: (i, k)),   # activations
                pl.BlockSpec((tk, tn), lambda i, j, k: (k, j)),   # fused weight
                pl.BlockSpec((1, tn), lambda i, j, k: (0, j)),    # fused bias
            ],
            out_specs=pl.BlockSpec((tm, tn), lambda i, j, k: (i, j)),
            scratch_shapes=[pltpu.VMEM((tm, tn), jnp.float32)],
        ),
        compiler_params=pltpu.CompilerParams(
            dimension_semantics=("parallel", "parallel", "arbitrary"),
        ),
    )(xp, wp, bp)

    if Bp == B and Hp == H:
        return out
    return out[:B, :H]


# ----------------------------------------------------------------------------
# Parameter packing (init-time; run once, NOT per forward call).
# ----------------------------------------------------------------------------
def fuse_double_linear_params(w1, b1, w2, b2):
    """Pack two PyTorch-style Linear heads into one lane-dense (D, Hp) slab."""
    H1, _ = w1.shape
    H2 = w2.shape[0]
    H = H1 + H2
    Hp = _round_up(H, 128)  # lane-dense output width (multiple of 128 lanes)

    w_fused = jnp.concatenate([jnp.transpose(w1), jnp.transpose(w2)], axis=1)  # (D, H)
    w_fused = _pad_axis(w_fused, 1, Hp)
    b_fused = _pad_axis(jnp.concatenate([b1, b2]).reshape(1, H), 1, Hp)
    return w_fused, b_fused, (H1, H2)


def double_linear_fused(x, w_fused, b_fused, heads):
    """Per-call forward with pre-packed params. Returns (y1, y2)."""
    H1, H2 = heads
    y = _fused_matmul(x, w_fused, b_fused)
    return y[:, :H1], y[:, H1 : H1 + H2]


def double_linear(x, w1, b1, w2, b2):
    """Drop-in DoubleLinear.forward: x (B, D); w_i (H_i, D); b_i (H_i,)."""
    w_fused, b_fused, heads = fuse_double_linear_params(w1, b1, w2, b2)
    return double_linear_fused(x, w_fused, b_fused, heads)


if __name__ == "__main__":
    # Small shapes consistent with the module: one backbone feature vector feeding
    # two Linear heads.
    B, D, H1, H2 = 8, 32, 64, 48

    key = jax.random.PRNGKey(0)
    kx, kw1, kb1, kw2, kb2 = jax.random.split(key, 5)
    x = jax.random.normal(kx, (B, D), dtype=jnp.float32)
    w1 = jax.random.normal(kw1, (H1, D), dtype=jnp.float32) * 0.1
    b1 = jax.random.normal(kb1, (H1,), dtype=jnp.float32) * 0.1
    w2 = jax.random.normal(kw2, (H2, D), dtype=jnp.float32) * 0.1
    b2 = jax.random.normal(kb2, (H2,), dtype=jnp.float32) * 0.1

    # Init-time packing (would normally be cached alongside the parameters).
    w_fused, b_fused, heads = fuse_double_linear_params(w1, b1, w2, b2)

    # Recommended per-call path: pre-packed params, no per-call transpose/concat.
    fwd = jax.jit(functools.partial(double_linear_fused, heads=heads))
    y1, y2 = fwd(x, w_fused, b_fused)
    jax.block_until_ready((y1, y2))

    # Convenience drop-in path (matches the module's forward signature).
    z1, z2 = jax.jit(double_linear)(x, w1, b1, w2, b2)
    jax.block_until_ready((z1, z2))

    # Reference check against plain JAX (same semantics as torch.nn.Linear).
    ref1 = x @ w1.T + b1
    ref2 = x @ w2.T + b2
    assert y1.shape == (B, H1) and y2.shape == (B, H2)
    assert jnp.allclose(y1, ref1, atol=1e-4, rtol=1e-4)
    assert jnp.allclose(y2, ref2, atol=1e-4, rtol=1e-4)
    assert jnp.allclose(z1, ref1, atol=1e-4, rtol=1e-4)
    assert jnp.allclose(z2, ref2, atol=1e-4, rtol=1e-4)

    print("KERNEL_OK")
</pallas_src>

<mosaic_0001>
module attributes {stable_mosaic.version = 11 : i64} {
  func.func @_fused_linear_kernel(%arg0: i32, %arg1: i32, %arg2: i32, %arg3: memref<8x32xf32, #tpu.memory_space<vmem>>, %arg4: memref<32x128xf32, #tpu.memory_space<vmem>>, %arg5: memref<1x128xf32, #tpu.memory_space<vmem>>, %arg6: memref<8x128xf32, #tpu.memory_space<vmem>>, %arg7: memref<8x128xf32, #tpu.memory_space<vmem>>) attributes {dimension_semantics = [#tpu.dimension_semantics<parallel>, #tpu.dimension_semantics<parallel>, #tpu.dimension_semantics<arbitrary>], iteration_bounds = array<i64: 1, 1, 1>, scalar_prefetch = 0 : i64, scratch_operands = 1 : i64, tpu.core_type = #tpu.core_type<tc>, window_params = [{transform_indices = @transform_0, window_bounds = array<i64: 8, 32>}, {transform_indices = @transform_1, window_bounds = array<i64: 32, 128>}, {transform_indices = @transform_2, window_bounds = array<i64: 1, 128>}, {transform_indices = @transform_3, window_bounds = array<i64: 8, 128>}]} {
    %c0_i32 = arith.constant 0 : i32
    %0 = arith.cmpi eq, %arg2, %c0_i32 : i32
    %1 = arith.extui %0 : i1 to i32
    %c0_i32_0 = arith.constant 0 : i32
    %2 = arith.cmpi ne, %1, %c0_i32_0 : i32
    scf.if %2 {
      %cst_10 = arith.constant 0.000000e+00 : f32
      %12 = vector.broadcast %cst_10 : f32 to vector<8x128xf32>
      %c0_11 = arith.constant 0 : index
      %c0_12 = arith.constant 0 : index
      %13 = vector.load %arg7[%c0_11, %c0_12] : memref<8x128xf32, #tpu.memory_space<vmem>>, vector<8x128xf32>
      tpu.vector_store %arg7[%c0_11, %c0_12], %12 {strides = array<i32>} : memref<8x128xf32, #tpu.memory_space<vmem>>, vector<8x128xf32>,
    } else {
    }
    %c0 = arith.constant 0 : index
    %c0_1 = arith.constant 0 : index
    %3 = vector.load %arg7[%c0, %c0_1] : memref<8x128xf32, #tpu.memory_space<vmem>>, vector<8x128xf32>
    %c0_2 = arith.constant 0 : index
    %c0_3 = arith.constant 0 : index
    %4 = vector.load %arg3[%c0_2, %c0_3] : memref<8x32xf32, #tpu.memory_space<vmem>>, vector<8x32xf32>
    %c0_4 = arith.constant 0 : index
    %c0_5 = arith.constant 0 : index
    %5 = vector.load %arg4[%c0_4, %c0_5] : memref<32x128xf32, #tpu.memory_space<vmem>>, vector<32x128xf32>
    %cst = arith.constant dense<0.000000e+00> : vector<8x128xf32>
    %6 = tpu.matmul %4, %5, %cst {dimension_numbers = #tpu.dot_dimension_numbers<[1], [0], [0], [1], [0, 0, 1, 1], [], []>} : vector<8x32xf32>, vector<32x128xf32>, vector<8x128xf32> -> vector<8x128xf32>
    %7 = arith.addf %3, %6 : vector<8x128xf32>
    %c0_6 = arith.constant 0 : index
    %c0_7 = arith.constant 0 : index
    %8 = vector.load %arg7[%c0_6, %c0_7] : memref<8x128xf32, #tpu.memory_space<vmem>>, vector<8x128xf32>
    tpu.vector_store %arg7[%c0_6, %c0_7], %7 {strides = array<i32>} : memref<8x128xf32, #tpu.memory_space<vmem>>, vector<8x128xf32>,
    %c0_i32_8 = arith.constant 0 : i32
    %9 = arith.cmpi eq, %arg2, %c0_i32_8 : i32
    %10 = arith.extui %9 : i1 to i32
    %c0_i32_9 = arith.constant 0 : i32
    %11 = arith.cmpi ne, %10, %c0_i32_9 : i32
    scf.if %11 {
      %c0_10 = arith.constant 0 : index
      %c0_11 = arith.constant 0 : index
      %12 = vector.load %arg7[%c0_10, %c0_11] : memref<8x128xf32, #tpu.memory_space<vmem>>, vector<8x128xf32>
      %c0_12 = arith.constant 0 : index
      %c0_13 = arith.constant 0 : index
      %13 = vector.load %arg5[%c0_12, %c0_13] : memref<1x128xf32, #tpu.memory_space<vmem>>, vector<1x128xf32>
      %14 = vector.broadcast %13 : vector<1x128xf32> to vector<8x128xf32>
      %15 = arith.addf %12, %14 : vector<8x128xf32>
      %c0_14 = arith.constant 0 : index
      %c0_15 = arith.constant 0 : index
      %16 = vector.load %arg6[%c0_14, %c0_15] : memref<8x128xf32, #tpu.memory_space<vmem>>, vector<8x128xf32>
      tpu.vector_store %arg6[%c0_14, %c0_15], %15 {strides = array<i32>} : memref<8x128xf32, #tpu.memory_space<vmem>>, vector<8x128xf32>,
    } else {
    }
    return
  }
  func.func @transform_0(%arg0: i32, %arg1: i32, %arg2: i32) -> (i32, i32) {
    %c0_i32 = arith.constant 0 : i32
    return %arg0, %arg2 : i32, i32
  }
  func.func @transform_1(%arg0: i32, %arg1: i32, %arg2: i32) -> (i32, i32) {
    %c0_i32 = arith.constant 0 : i32
    return %arg2, %arg1 : i32, i32
  }
  func.func @transform_2(%arg0: i32, %arg1: i32, %arg2: i32) -> (i32, i32) {
    %c0_i32 = arith.constant 0 : i32
    %c0_i32_0 = arith.constant 0 : i32
    return %c0_i32, %arg1 : i32, i32
  }
  func.func @transform_3(%arg0: i32, %arg1: i32, %arg2: i32) -> (i32, i32) {
    %c0_i32 = arith.constant 0 : i32
    return %arg0, %arg1 : i32, i32
  }
}

</mosaic_0001>

<bundles_post_ra>
// kernel: double_linear_fused.1
= control target key start
LH: loop header
LB: loop body
LE: loop exit
PB: predicated region body
PF: predicated region fallthrough
CT: control target
= control target key end

     0   :  { %8 = vsyncpa [#allocation4], 0  ;;  %s289_s0 = inlined_call_operand.hbm [shape: f32[8,32], index: 0, kind: input, shape index: {}]   ;;  %s290_s1 = inlined_call_operand.hbm [shape: f32[32,128], index: 1, kind: input, shape index: {}]   ;;  %s291_s2 = inlined_call_operand.vmem [shape: f32[1,128], index: 2, kind: input, shape index: {}]   ;;  %s292_s3 = inlined_call_operand.vmem [shape: f32[8,128], index: 3, kind: output, shape index: {}]  }
   0x1   :  { %9 = vsyncpa [#allocation6], 0  ;;  %s225_s12 = smov [#allocation3]   ;;  %s226_s14 = smov [#allocation5]  }
   0x2   :  { %s16_s13 = sshll.u32 %s225_s12, 4  ;;  %s25_s15 = sshll.u32 %s226_s14, 4  ;;  %s17_s13 = int_to_ptr.vmem [resolvable:$true] %s16_s13  ;;  %s252_s15 = int_to_ptr.vmem [resolvable:$true] %s25_s15 }
   0x3   :  { %s177_s18 = scalar_lea.hbm %s289_s0, 128 }
   0x4   :  { %p178_p0 = scmp.ne.s32.totalorder %s289_s0, %s177_s18  ;;  %p181_p1 = scmp.lt.u32.totalorder %s177_s18, %s289_s0 }
   0x6   :  { %p183_p2 = pnand %p181_p1, %p178_p0 }
   0x8   :  { %186 = shalt.err (!%p183_p2)
}
   0x9   :  { %s187_s23 = scalar_lea.vmem %s17_s13, 128  ;;  %p192_p4 = scmp.lt.s32.totalorder %s17_s13, %s17_s13 }
   0xa   :  { %p188_p3 = scmp.ne.s32.totalorder %s17_s13, %s187_s23  ;;  %p193_p5 = scmp.lt.s32.totalorder %s187_s23, %s187_s23 }
   0xc   :  { %p194_p6 = por %p193_p5, %p192_p4 }
   0xe   :  { %p195_p7 = pnand %p194_p6, %p188_p3 }
  0x10   :  { %198 = shalt.err (!%p195_p7)
}
  0x11   :  { %19 = dma.hbm_to_vmem [thread:$0]  %s289_s0, 128, %s17_s13, [#allocation4]  }
  0x12   :  { %s199_s28 = scalar_lea.hbm %s290_s1, 512 }
  0x13   :  { %p200_p8 = scmp.ne.s32.totalorder %s290_s1, %s199_s28  ;;  %p203_p9 = scmp.lt.u32.totalorder %s199_s28, %s290_s1 }
  0x15   :  { %p205_p10 = pnand %p203_p9, %p200_p8 }
  0x17   :  { %208 = shalt.err (!%p205_p10)
}
  0x18   :  { %s209_s6 = scalar_lea.vmem %s252_s15, 512  ;;  %p214_p12 = scmp.lt.s32.totalorder %s252_s15, %s252_s15 }
  0x19   :  { %p210_p11 = scmp.ne.s32.totalorder %s252_s15, %s209_s6  ;;  %p215_p13 = scmp.lt.s32.totalorder %s209_s6, %s209_s6 }
  0x1b   :  { %p216_p0 = por %p215_p13, %p214_p12 }
  0x1d   :  { %p217_p1 = pnand %p216_p0, %p210_p11 }
  0x1f   :  { %220 = shalt.err (!%p217_p1)
}
  0x20   :  { %s227_s0 = smov 128   ;;  %s228_s7 = smov 8  }
  0x21   :  { %31 = dma.hbm_to_vmem [thread:$0]  %s290_s1, 512, %s252_s15, [#allocation6], %s227_s0, %s227_s0, %s228_s7  }
  0x22   :  { %221 = dma.done.wait [#allocation4], 128  }
  0x23   :  { %222 = vsyncadd [#allocation4], 4294967168 }
  0x24   :  { %223 = dma.done.wait [#allocation6], 512  }
  0x25   :  { %224 = vsyncadd [#allocation6], 4294966784  ;;  %v229_v0 = vmov 0.0|0.0   ;;  %vm230_vm0 = vmmov 0   ;;  %v231_v1 = vmov 0.0   ;;  %v47_v2 = vld [vmem:[#allocation5] sm:$0xff] }
  0x26   :  { %164 = vmatprep.subr.bf16.mxu0 %v229_v0  ;;  %161 = vmatprep.mubr.msk.f32.mxu0 %vm230_vm0, %v231_v1  ;;  %v48_v3 = vld [vmem:[#allocation5 + $0x8] sm:$0xff]  ;;  %v49_v4 = vld [vmem:[#allocation5 + $0x10] sm:$0xff]  ;;  %v50_v6 = vld [vmem:[#allocation5 + $0x18] sm:$0xff]  ;;  %vm51_vm1 = vcmask 261120  }
  0x27   :  { %v165_v5 = vpack.c.bf16 %v48_v3, %v47_v2  ;;  %v168_v7 = vpack.c.bf16 %v50_v6, %v49_v4  ;;  %v46_v8 = vld [vmem:[#allocation3] sm:$0xff]  ;;  %v147_v9 = vld [vmem:[%s291_s2] ss:$0 sm:$0xff] }
  0x29   :  { %166 = vmatpush3.bf16.msra.mxu0 %v165_v5 }
  0x2a   :  { %167 = vmatprep.subr.bf16.mxu0 %v229_v0 }
  0x2d   :  { %169 = vmatpush3.bf16.msra.mxu0 %v168_v7 }
  0x30   :  { %162 = vmatmul.mubr.msk.f32.vlgmr.msra.gmra.mrb[0].mxu0 %vm51_vm1, %v46_v8 }
 0x103   :  { %v121_v10 = vpop.f32.mrb[0].mxu0 }
 0x104   :  { %v138_v11 = vadd.f32 %v147_v9, %v121_v10  ;;  %v163_v12 = vpop.f32.mrb[1].mxu0 }
 0x106   :  { %139 = vst [vmem:[%s292_s3] sm:$0xff] %v138_v11 }
 0x107   :  { %144 = vsyncpa [#allocation4], 1 }
 0x108   :  { %145 = vsyncpa [#allocation6], 1 }

</bundles_post_ra>
